<compile_context>
chip_gen: v7x
topology: tpu7x:2x2x1
jax: 0.10.0
libtpu: 0.0.40
codegen_flags: <defaults>
</compile_context>

<pallas_src>
import functools
import math

import jax
import jax.numpy as jnp
from jax.experimental import pallas as pl
from jax.experimental.pallas import tpu as pltpu


# ----------------------------------------------------------------------------
# Small helpers
# ----------------------------------------------------------------------------
def _round_up(x, m):
    return ((x + m - 1) // m) * m


def _vmem_limit_bytes():
    # Re-derive per TPU generation (~75% of physical VMEM, leaving headroom for
    # Mosaic-internal scratch): v5e/v6e 128 MiB -> 96 MiB, v7x 64 MiB -> 48 MiB.
    try:
        cap = int(pltpu.get_tpu_info().vmem_capacity_bytes)
    except Exception:
        cap = 64 * 1024 * 1024
    return (cap * 3) // 4


def _pick_batch_block(batch):
    # Amortize the per-layer weight stream over several batch items (review:
    # Bt>=2-4 flips the encoder from weight-DMA-bound to compute-bound at ViT
    # sizes).  Bounded by VMEM at large D; 4 is safe across v5e/v6e/v7x at
    # ViT-B scale.  Keep >=2 blocks on the parallel axis when possible (v7x
    # has 2 TensorCores/chip).
    for bt in (4, 3, 2, 1):
        if batch % bt == 0:
            return bt
    return 1


def _const_index_map(ndim):
    return lambda *args: (0,) * ndim


def _layernorm(x, w, b, eps=1e-5):
    mu = jnp.mean(x, axis=-1, keepdims=True)
    var = jnp.mean((x - mu) ** 2, axis=-1, keepdims=True)
    return (x - mu) * jax.lax.rsqrt(var + eps) * w + b


def _gelu(x):
    # TODO(synk): PyTorch nn.GELU default is erf-based; tanh approximation used
    # here for a guaranteed-clean Mosaic lowering (small systematic difference).
    return jax.nn.gelu(x, approximate=True)


# ----------------------------------------------------------------------------
# Kernels
# ----------------------------------------------------------------------------
def _embed_kernel(patches_ref, w_ref, b_ref, cls_ref, pos_ref, out_ref):
    """Patch linear-embed + CLS prepend + pos-embed add, one batch item/step.

    Direct slice stores (no sublane-offset concatenate). Padded tail rows are
    written with zeros so every token row stays finite (they are masked out of
    every attention softmax downstream).
    """
    np_ = patches_ref.shape[1]
    n_pad = pos_ref.shape[1]
    d = pos_ref.shape[2]

    tok = jnp.dot(patches_ref[0].astype(jnp.bfloat16), w_ref[...],
                  preferred_element_type=jnp.float32) + b_ref[...]      # (Np, D)

    out_ref[0, pl.ds(0, 1), :] = cls_ref[0] + pos_ref[0, pl.ds(0, 1), :]
    out_ref[0, pl.ds(1, np_), :] = tok + pos_ref[0, pl.ds(1, np_), :]
    tail = n_pad - np_ - 1
    if tail > 0:
        out_ref[0, pl.ds(np_ + 1, tail), :] = jnp.zeros((tail, d), jnp.float32)


def _encoder_kernel(x_ref, bias_ref, vec_ref, wqkv_ref, wo_ref, w1_ref, w2_ref,
                    out_ref, *, heads):
    """All transformer blocks fused; grid = (B // Bt, depth), depth innermost.

    The (Bt, N_pad, D) activation block stays VMEM-resident across the whole
    depth axis (out index_map ignores the layer index); per-layer weights are
    streamed one depth-slice per grid step.
    """
    layer = pl.program_id(1)

    @pl.when(layer == 0)
    def _():
        out_ref[...] = x_ref[...]      # load the residual stream once per batch block

    bt, n, d = out_ref.shape
    head_dim = d // heads
    hidden = w1_ref.shape[2]
    x = out_ref[...].reshape(bt * n, d)          # (Bt*N, D) f32 residual stream
    bias = bias_ref[...]                         # (1, N) additive key mask (0 / -1e9)

    # Packed per-layer vectors: [ln1w|ln1b|bqkv|bo|ls1|ln2w|ln2b|b1|b2|ls2]
    vec = vec_ref[0]                             # (1, V)
    off = 0

    def take(size):
        nonlocal off
        sl = vec[:, off:off + size]
        off += size
        return sl

    ln1w, ln1b = take(d), take(d)
    bqkv = take(3 * d)
    bo, ls1 = take(d), take(d)
    ln2w, ln2b = take(d), take(d)
    b1 = take(hidden)
    b2, ls2 = take(d), take(d)

    # ---- attention branch: x + ls1 * MSA(LN1(x)) ----------------------------
    xn = _layernorm(x, ln1w, ln1b).astype(jnp.bfloat16)
    # Single fused lane-dense projection (1/sqrt(head_dim) folded into wqkv).
    qkv = jnp.dot(xn, wqkv_ref[0],
                  preferred_element_type=jnp.float32) + bqkv          # (Bt*N, 3D)

    o_batches = []
    for b in range(bt):                          # static unroll over batch block
        r = b * n
        o_heads = []
        for h in range(heads):                   # static unroll over heads
            c = h * head_dim
            q = qkv[r:r + n, c:c + head_dim].astype(jnp.bfloat16)
            k = qkv[r:r + n, d + c:d + c + head_dim].astype(jnp.bfloat16)
            v = qkv[r:r + n, 2 * d + c:2 * d + c + head_dim].astype(jnp.bfloat16)
            s = jnp.einsum('qc,mc->qm', q, k,
                           preferred_element_type=jnp.float32) + bias  # (N, N)
            s = s - jnp.max(s, axis=-1, keepdims=True)
            p = jnp.exp(s)
            p = p * pl.reciprocal(jnp.sum(p, axis=-1, keepdims=True), approx=True)
            o_heads.append(jnp.dot(p.astype(jnp.bfloat16), v,
                                   preferred_element_type=jnp.float32))  # (N, hd)
        o_batches.append(jnp.concatenate(o_heads, axis=-1))            # (N, D)
    o = o_batches[0] if bt == 1 else jnp.concatenate(o_batches, axis=0)  # (Bt*N, D)

    # Lane-dense output projection: one (Bt*N, D) x (D, D) matmul — no (H,N,D)
    # f32 intermediate and no cross-head VPU reduction.
    attn = jnp.dot(o.astype(jnp.bfloat16), wo_ref[0],
                   preferred_element_type=jnp.float32) + bo
    x = x + ls1 * attn

    # ---- mlp branch: x + ls2 * MLP(LN2(x)) -----------------------------------
    xn2 = _layernorm(x, ln2w, ln2b).astype(jnp.bfloat16)
    h1 = _gelu(jnp.dot(xn2, w1_ref[0],
                       preferred_element_type=jnp.float32) + b1)
    mlp = jnp.dot(h1.astype(jnp.bfloat16), w2_ref[0],
                  preferred_element_type=jnp.float32) + b2
    x = x + ls2 * mlp

    out_ref[...] = x.reshape(bt, n, d)


def _head_kernel(x_ref, lnw_ref, lnb_ref, w1_ref, b1_ref, w2_ref, b2_ref,
                 wcls_ref, bcls_ref, out_ref):
    """Encoder final LayerNorm + MLP head + classifier (lane-padded output)."""
    x = x_ref[0]                                                  # (N, D)
    xn = _layernorm(x, lnw_ref[...], lnb_ref[...])
    h = _gelu(jnp.dot(xn.astype(jnp.bfloat16), w1_ref[...],
                      preferred_element_type=jnp.float32) + b1_ref[...])
    y = jnp.dot(h.astype(jnp.bfloat16), w2_ref[...],
                preferred_element_type=jnp.float32) + b2_ref[...]
    out_ref[0] = jnp.dot(y.astype(jnp.bfloat16), wcls_ref[...],
                         preferred_element_type=jnp.float32) + bcls_ref[...]


# ----------------------------------------------------------------------------
# Wrappers
# ----------------------------------------------------------------------------
def run_embed(patches, params):
    B, Np, K = patches.shape
    D = params['patch_w'].shape[1]
    N_pad = params['pos_embed'].shape[1]
    return pl.pallas_call(
        _embed_kernel,
        out_shape=jax.ShapeDtypeStruct((B, N_pad, D), jnp.float32),
        grid=(B,),
        in_specs=[pl.BlockSpec((1, Np, K), lambda b: (b, 0, 0)),
                  pl.BlockSpec((K, D), lambda b: (0, 0)),
                  pl.BlockSpec((1, D), lambda b: (0, 0)),
                  pl.BlockSpec((1, 1, D), lambda b: (0, 0, 0)),
                  pl.BlockSpec((1, N_pad, D), lambda b: (0, 0, 0))],
        out_specs=pl.BlockSpec((1, N_pad, D), lambda b: (b, 0, 0)),
        compiler_params=pltpu.CompilerParams(
            dimension_semantics=("parallel",),
            vmem_limit_bytes=_vmem_limit_bytes()),
    )(patches, params['patch_w'], params['patch_b'],
      params['cls_token'], params['pos_embed'])


def run_encoder(x, key_bias, bw, *, heads, batch_block):
    B, N_pad, D = x.shape
    depth = bw['wqkv'].shape[0]
    hidden = bw['w1'].shape[2]
    V = bw['vecs'].shape[2]
    bt = batch_block
    assert B % bt == 0, "batch must be divisible by the batch block"

    kern = functools.partial(_encoder_kernel, heads=heads)
    in_specs = [
        # Activations: index_map ignores the layer index -> only (re)fetched /
        # written back when the batch-block index changes.
        pl.BlockSpec((bt, N_pad, D), lambda b, l: (b, 0, 0)),
        pl.BlockSpec((1, N_pad), lambda b, l: (0, 0)),
        # Depth-stacked weights, streamed one layer per grid step:
        pl.BlockSpec((1, 1, V), lambda b, l: (l, 0, 0)),          # packed vectors
        pl.BlockSpec((1, D, 3 * D), lambda b, l: (l, 0, 0)),      # fused qkv
        pl.BlockSpec((1, D, D), lambda b, l: (l, 0, 0)),          # out proj
        pl.BlockSpec((1, D, hidden), lambda b, l: (l, 0, 0)),     # mlp fc1
        pl.BlockSpec((1, hidden, D), lambda b, l: (l, 0, 0)),     # mlp fc2
    ]
    # TODO(synk): on v5e/v6e (128 MiB VMEM), pipeline_mode=pl.Buffered(3) on the
    # big weight streams can hide residual DMA exposure; skipped here to keep a
    # single VMEM budget that also fits v7x (64 MiB).
    return pl.pallas_call(
        kern,
        out_shape=jax.ShapeDtypeStruct((B, N_pad, D), jnp.float32),
        grid=(B // bt, depth),
        in_specs=in_specs,
        # Same block index across the depth axis -> activations stay in VMEM
        # for the whole stack; HBM writeback only when the batch block changes.
        out_specs=pl.BlockSpec((bt, N_pad, D), lambda b, l: (b, 0, 0)),
        compiler_params=pltpu.CompilerParams(
            dimension_semantics=("parallel", "arbitrary"),
            vmem_limit_bytes=_vmem_limit_bytes()),
    )(x, key_bias, bw['vecs'], bw['wqkv'], bw['wo'], bw['w1'], bw['w2'])


def run_head(x, hp):
    B, N_pad, D = x.shape
    C_pad = hp['wcls'].shape[1]
    weights = [hp['normw'], hp['normb'], hp['w1'], hp['b1'],
               hp['w2'], hp['b2'], hp['wcls'], hp['bcls']]
    in_specs = ([pl.BlockSpec((1, N_pad, D), lambda b: (b, 0, 0))]
                + [pl.BlockSpec(tuple(w.shape), _const_index_map(w.ndim))
                   for w in weights])
    return pl.pallas_call(
        _head_kernel,
        out_shape=jax.ShapeDtypeStruct((B, N_pad, C_pad), jnp.float32),
        grid=(B,),
        in_specs=in_specs,
        out_specs=pl.BlockSpec((1, N_pad, C_pad), lambda b: (b, 0, 0)),
        compiler_params=pltpu.CompilerParams(
            dimension_semantics=("parallel",),
            vmem_limit_bytes=_vmem_limit_bytes()),
    )(x, *weights)


def dpx_dense_pretrainer_forward(img, params, *, patch_size, heads, n_classes,
                                 batch_block=None):
    """Forward pass.  Returns (logits, seg, amask) like the PyTorch module."""
    B, C, H, W = img.shape
    P = patch_size

    # TODO(synk): DPXTokenizer / DPXExtractor / DPXEmbedder sources unavailable;
    # stand-in = patchify + linear embed + CLS token + learned pos-embed.
    patches = (img.reshape(B, C, H // P, P, W // P, P)
                  .transpose(0, 2, 4, 1, 3, 5)
                  .reshape(B, (H // P) * (W // P), C * P * P))
    Np = patches.shape[1]
    N = Np + 1
    N_pad = params['pos_embed'].shape[1]

    x = run_embed(patches, params)                          # (B, N_pad, D)

    # Additive key mask: padded tokens are excluded from every softmax.
    valid = jnp.arange(N_pad) < N
    key_bias = jnp.where(valid, 0.0, -1e9).astype(jnp.float32)[None, :]   # (1, N_pad)

    if batch_block is None:
        batch_block = _pick_batch_block(B)
    x = run_encoder(x, key_bias, params['blocks'], heads=heads,
                    batch_block=batch_block)

    logits_pad = run_head(x, params['head'])                # (B, N_pad, C_pad)
    logits = logits_pad[:, :N, :n_classes]

    # TODO(synk): TokenMerging is identity (tome_ratio=0); seg/amask pass through.
    seg = jnp.zeros((B, N), jnp.int32)
    amask = jnp.ones((B, N), jnp.float32)
    return logits, seg, amask


# ----------------------------------------------------------------------------
# Deterministic parameter initialization (fused / packed, bf16 matmul weights)
# ----------------------------------------------------------------------------
def init_params(key, *, channels, patch_size, embed_dim, heads, depth,
                mlp_ratio, n_classes, num_patches, init_scale=0.1):
    assert embed_dim % heads == 0
    D = embed_dim
    hd = D // heads
    hidden = int(D * mlp_ratio)
    K = channels * patch_size * patch_size
    N = num_patches + 1
    # Pad tokens to a sublane multiple; at larger N, pad to a lane multiple so
    # the (N, N) score matrix / PV contraction are 128-aligned.
    N_pad = _round_up(N, 128) if N >= 96 else _round_up(N, 8)
    C_pad = _round_up(n_classes, 128)
    keys = jax.random.split(key, 12)

    def rnd(k, shape):
        return jax.random.normal(k, shape, jnp.float32) * 0.02

    pos = jnp.pad(rnd(keys[0], (1, N, D)), ((0, 0), (0, N_pad - N), (0, 0)))
    wcls = jnp.pad(rnd(keys[1], (D, n_classes)),
                   ((0, 0), (0, C_pad - n_classes)))

    # Fused QKV weight (depth, D, 3D); the 1/sqrt(head_dim) q-scale is folded
    # into the q columns (and would apply to the q bias if it were nonzero).
    wqkv = rnd(keys[4], (depth, D, 3 * D))
    wqkv = wqkv.at[:, :, :D].multiply(1.0 / math.sqrt(hd))

    # Packed small per-layer vectors, one lane-concatenated (depth, 1, V) array:
    #   [ln1w | ln1b | bqkv | bo | ls1 | ln2w | ln2b | b1 | b2 | ls2]
    zd = jnp.zeros((depth, 1, D), jnp.float32)
    od = jnp.ones((depth, 1, D), jnp.float32)
    sd = jnp.full((depth, 1, D), init_scale, jnp.float32)
    vecs = jnp.concatenate([
        od, zd,                                        # ln1w, ln1b
        jnp.zeros((depth, 1, 3 * D), jnp.float32),     # bqkv (zero; q-scale no-op)
        zd, sd,                                        # bo, ls1
        od, zd,                                        # ln2w, ln2b
        jnp.zeros((depth, 1, hidden), jnp.float32),    # b1
        zd, sd,                                        # b2, ls2
    ], axis=-1)

    # TODO(synk): on v7x, fp8 storage for wqkv/wo/w1/w2 (with per-tensor scales)
    # would halve weight-DMA bytes; kept bf16 here for accuracy parity.
    params = {
        'patch_w': rnd(keys[2], (K, D)).astype(jnp.bfloat16),
        'patch_b': jnp.zeros((1, D), jnp.float32),
        'pos_embed': pos,                              # (1, N_pad, D) f32
        'cls_token': rnd(keys[3], (1, 1, D)),
        'blocks': {
            'vecs': vecs,                              # (depth, 1, 11D + hidden) f32
            'wqkv': wqkv.astype(jnp.bfloat16),         # (depth, D, 3D)
            'wo': rnd(keys[7], (depth, D, D)).astype(jnp.bfloat16),
            'w1': rnd(keys[8], (depth, D, hidden)).astype(jnp.bfloat16),
            'w2': rnd(keys[9], (depth, hidden, D)).astype(jnp.bfloat16),
        },
        'head': {
            'normw': jnp.ones((1, D), jnp.float32),
            'normb': jnp.zeros((1, D), jnp.float32),
            'w1': rnd(keys[10], (D, hidden)).astype(jnp.bfloat16),
            'b1': jnp.zeros((1, hidden), jnp.float32),
            'w2': rnd(keys[11], (hidden, D)).astype(jnp.bfloat16),
            'b2': jnp.zeros((1, D), jnp.float32),
            'wcls': wcls.astype(jnp.bfloat16),         # (D, C_pad)
            'bcls': jnp.zeros((1, C_pad), jnp.float32),
        },
    }
    return params


# ----------------------------------------------------------------------------
# Main
# ----------------------------------------------------------------------------
if __name__ == "__main__":
    B, C, H, W = 2, 3, 16, 16
    patch_size = 4
    embed_dim = 32
    heads = 4
    depth = 2
    mlp_ratio = 4.0
    n_classes = 201
    num_patches = (H // patch_size) * (W // patch_size)

    key = jax.random.PRNGKey(0)
    k_param, k_img = jax.random.split(key)
    params = init_params(k_param, channels=C, patch_size=patch_size,
                         embed_dim=embed_dim, heads=heads, depth=depth,
                         mlp_ratio=mlp_ratio, n_classes=n_classes,
                         num_patches=num_patches)
    img = jax.random.normal(k_img, (B, C, H, W), jnp.float32)   # NCHW

    logits, seg, amask = dpx_dense_pretrainer_forward(
        img, params, patch_size=patch_size, heads=heads, n_classes=n_classes)
    jax.block_until_ready((logits, seg, amask))

    N = num_patches + 1
    assert logits.shape == (B, N, n_classes)
    assert seg.shape == (B, N)
    assert amask.shape == (B, N)
    assert bool(jnp.all(jnp.isfinite(logits)))
    print("KERNEL_OK")
</pallas_src>

<mosaic_0001>
module attributes {stable_mosaic.version = 11 : i64} {
  func.func @_embed_kernel(%arg0: i32, %arg1: memref<1x16x48xf32, #tpu.memory_space<vmem>>, %arg2: memref<48x32xbf16, #tpu.memory_space<vmem>>, %arg3: memref<1x32xf32, #tpu.memory_space<vmem>>, %arg4: memref<1x1x32xf32, #tpu.memory_space<vmem>>, %arg5: memref<1x24x32xf32, #tpu.memory_space<vmem>>, %arg6: memref<1x24x32xf32, #tpu.memory_space<vmem>>) attributes {dimension_semantics = [#tpu.dimension_semantics<parallel>], iteration_bounds = array<i64: 2>, scalar_prefetch = 0 : i64, scratch_operands = 0 : i64, tpu.core_type = #tpu.core_type<tc>, window_params = [{transform_indices = @transform_0, window_bounds = array<i64: 1, 16, 48>}, {pipeline_mode = #tpu.pipeline_mode<synchronous>, transform_indices = @transform_1, window_bounds = array<i64: 48, 32>}, {pipeline_mode = #tpu.pipeline_mode<synchronous>, transform_indices = @transform_2, window_bounds = array<i64: 1, 32>}, {pipeline_mode = #tpu.pipeline_mode<synchronous>, transform_indices = @transform_3, window_bounds = array<i64: 1, 1, 32>}, {pipeline_mode = #tpu.pipeline_mode<synchronous>, transform_indices = @transform_4, window_bounds = array<i64: 1, 24, 32>}, {transform_indices = @transform_5, window_bounds = array<i64: 1, 24, 32>}]} {
    %c0 = arith.constant 0 : index
    %c0_0 = arith.constant 0 : index
    %c0_1 = arith.constant 0 : index
    %0 = vector.load %arg1[%c0, %c0_0, %c0_1] : memref<1x16x48xf32, #tpu.memory_space<vmem>>, vector<1x16x48xf32>
    %1 = vector.shape_cast %0 : vector<1x16x48xf32> to vector<16x48xf32>
    %2 = arith.truncf %1 : vector<16x48xf32> to vector<16x48xbf16>
    %c0_2 = arith.constant 0 : index
    %c0_3 = arith.constant 0 : index
    %3 = vector.load %arg2[%c0_2, %c0_3] : memref<48x32xbf16, #tpu.memory_space<vmem>>, vector<48x32xbf16>
    %cst = arith.constant dense<0.000000e+00> : vector<16x32xf32>
    %4 = tpu.matmul %2, %3, %cst {dimension_numbers = #tpu.dot_dimension_numbers<[1], [0], [0], [1], [0, 0, 1, 1], [], []>} : vector<16x48xbf16>, vector<48x32xbf16>, vector<16x32xf32> -> vector<16x32xf32>
    %c0_4 = arith.constant 0 : index
    %c0_5 = arith.constant 0 : index
    %5 = vector.load %arg3[%c0_4, %c0_5] : memref<1x32xf32, #tpu.memory_space<vmem>>, vector<1x32xf32>
    %6 = vector.broadcast %5 : vector<1x32xf32> to vector<16x32xf32>
    %7 = arith.addf %4, %6 : vector<16x32xf32>
    %c0_6 = arith.constant 0 : index
    %c0_7 = arith.constant 0 : index
    %c0_8 = arith.constant 0 : index
    %8 = vector.load %arg4[%c0_6, %c0_7, %c0_8] : memref<1x1x32xf32, #tpu.memory_space<vmem>>, vector<1x1x32xf32>
    %9 = vector.shape_cast %8 : vector<1x1x32xf32> to vector<1x32xf32>
    %c0_9 = arith.constant 0 : index
    %c0_10 = arith.constant 0 : index
    %c0_11 = arith.constant 0 : index
    %10 = vector.load %arg5[%c0_9, %c0_10, %c0_11] : memref<1x24x32xf32, #tpu.memory_space<vmem>>, vector<1x1x32xf32>
    %11 = vector.shape_cast %10 : vector<1x1x32xf32> to vector<1x32xf32>
    %12 = arith.addf %9, %11 : vector<1x32xf32>
    %c0_12 = arith.constant 0 : index
    %c0_13 = arith.constant 0 : index
    %c0_14 = arith.constant 0 : index
    %13 = vector.load %arg6[%c0_12, %c0_13, %c0_14] : memref<1x24x32xf32, #tpu.memory_space<vmem>>, vector<1x1x32xf32>
    %14 = vector.shape_cast %13 : vector<1x1x32xf32> to vector<1x32xf32>
    %15 = vector.shape_cast %12 : vector<1x32xf32> to vector<1x1x32xf32>
    tpu.vector_store %arg6[%c0_12, %c0_13, %c0_14], %15 {strides = array<i32>} : memref<1x24x32xf32, #tpu.memory_space<vmem>>, vector<1x1x32xf32>,
    %c0_15 = arith.constant 0 : index
    %c1 = arith.constant 1 : index
    %c0_16 = arith.constant 0 : index
    %16 = vector.load %arg5[%c0_15, %c1, %c0_16] : memref<1x24x32xf32, #tpu.memory_space<vmem>>, vector<1x16x32xf32>
    %17 = vector.shape_cast %16 : vector<1x16x32xf32> to vector<16x32xf32>
    %18 = arith.addf %7, %17 : vector<16x32xf32>
    %c0_17 = arith.constant 0 : index
    %c1_18 = arith.constant 1 : index
    %c0_19 = arith.constant 0 : index
    %19 = vector.load %arg6[%c0_17, %c1_18, %c0_19] : memref<1x24x32xf32, #tpu.memory_space<vmem>>, vector<1x16x32xf32>
    %20 = vector.shape_cast %19 : vector<1x16x32xf32> to vector<16x32xf32>
    %21 = vector.shape_cast %18 : vector<16x32xf32> to vector<1x16x32xf32>
    tpu.vector_store %arg6[%c0_17, %c1_18, %c0_19], %21 {strides = array<i32>} : memref<1x24x32xf32, #tpu.memory_space<vmem>>, vector<1x16x32xf32>,
    %cst_20 = arith.constant 0.000000e+00 : f32
    %22 = vector.broadcast %cst_20 : f32 to vector<7x32xf32>
    %c0_21 = arith.constant 0 : index
    %c17 = arith.constant 17 : index
    %c0_22 = arith.constant 0 : index
    %23 = vector.load %arg6[%c0_21, %c17, %c0_22] : memref<1x24x32xf32, #tpu.memory_space<vmem>>, vector<1x7x32xf32>
    %24 = vector.shape_cast %23 : vector<1x7x32xf32> to vector<7x32xf32>
    %25 = vector.shape_cast %22 : vector<7x32xf32> to vector<1x7x32xf32>
    tpu.vector_store %arg6[%c0_21, %c17, %c0_22], %25 {strides = array<i32>} : memref<1x24x32xf32, #tpu.memory_space<vmem>>, vector<1x7x32xf32>,
    return
  }
  func.func @transform_0(%arg0: i32) -> (i32, i32, i32) {
    %c0_i32 = arith.constant 0 : i32
    %c0_i32_0 = arith.constant 0 : i32
    %c0_i32_1 = arith.constant 0 : i32
    return %arg0, %c0_i32, %c0_i32_0 : i32, i32, i32
  }
  func.func @transform_1(%arg0: i32) -> (i32, i32) {
    %c0_i32 = arith.constant 0 : i32
    %c0_i32_0 = arith.constant 0 : i32
    %c0_i32_1 = arith.constant 0 : i32
    return %c0_i32, %c0_i32_0 : i32, i32
  }
  func.func @transform_2(%arg0: i32) -> (i32, i32) {
    %c0_i32 = arith.constant 0 : i32
    %c0_i32_0 = arith.constant 0 : i32
    %c0_i32_1 = arith.constant 0 : i32
    return %c0_i32, %c0_i32_0 : i32, i32
  }
  func.func @transform_3(%arg0: i32) -> (i32, i32, i32) {
    %c0_i32 = arith.constant 0 : i32
    %c0_i32_0 = arith.constant 0 : i32
    %c0_i32_1 = arith.constant 0 : i32
    %c0_i32_2 = arith.constant 0 : i32
    return %c0_i32, %c0_i32_0, %c0_i32_1 : i32, i32, i32
  }
  func.func @transform_4(%arg0: i32) -> (i32, i32, i32) {
    %c0_i32 = arith.constant 0 : i32
    %c0_i32_0 = arith.constant 0 : i32
    %c0_i32_1 = arith.constant 0 : i32
    %c0_i32_2 = arith.constant 0 : i32
    return %c0_i32, %c0_i32_0, %c0_i32_1 : i32, i32, i32
  }
  func.func @transform_5(%arg0: i32) -> (i32, i32, i32) {
    %c0_i32 = arith.constant 0 : i32
    %c0_i32_0 = arith.constant 0 : i32
    %c0_i32_1 = arith.constant 0 : i32
    return %arg0, %c0_i32, %c0_i32_0 : i32, i32, i32
  }
}

</mosaic_0001>

<bundles_post_ra>
// kernel: tpu_custom_call.1
= control target key start
LH: loop header
LB: loop body
LE: loop exit
PB: predicated region body
PF: predicated region fallthrough
CT: control target
= control target key end

     0   :  { %10 = vsyncpa [#allocation3], 0  ;;  %s810_s0 = inlined_call_operand.vmem [shape: f32[2,16,48], index: 0, kind: input, shape index: {}]   ;;  %s811_s1 = inlined_call_operand.vmem [shape: bf16[48,32], index: 1, kind: input, shape index: {}]   ;;  %s812_s2 = inlined_call_operand.vmem [shape: f32[1,32], index: 2, kind: input, shape index: {}]   ;;  %s813_s3 = inlined_call_operand.vmem [shape: f32[1,1,32], index: 3, kind: input, shape index: {}]   ;;  %s814_s4 = inlined_call_operand.hbm [shape: f32[1,24,32], index: 4, kind: input, shape index: {}]   ;;  %s815_s5 = inlined_call_operand.hbm [shape: f32[2,24,32], index: 5, kind: output, shape index: {}]  }
   0x1   :  { %11 = vsyncpa [#allocation4], 0 }
   0x2   :  { %13 = vsyncpa [#allocation4 + $0x1], 0  ;;  %s646_s18 = smov 0   ;;  %s648_s19 = smov 0  }
   0x3   :  { %s650_s20 = smov 0   ;;  %s652_s21 = smov 0  }
   0x4 LB: > { %s667_s22 = sadd.s32 4294967295, %s606_s21   ;;  %s420_s23 = sadd.s32 4294967294, %s606_s21   ;;  %s606_s21 = sphi %s652_s21, %s831_s21   ;;  %s602_s20 = sphi %s650_s20, %s830_s20   ;;  %s598_s19 = sphi %s648_s19, %s829_s19   ;;  %s594_s18 = sphi %s646_s18, %s828_s18  }
   0x5   : > { %s671_s24 = sadd.s32 1, %s606_s21   ;;  %s136_s25 = sadd.s32 1, %s602_s20 }
   0x6   : > { %s133_s26 = ssub.s32 %s606_s21, %s671_s24  ;;  %p146_p0 = scmp.ne.s32.totalorder %s602_s20, %s598_s19 }
   0x7   : > { %p134_p1 = scmp.eq.s32.totalorder %s133_s26, 0  ;;  %p147_p2 = scmp.eq.s32.totalorder %s667_s22, 1 }
   0x8   : > { %p152_p3 = scmp.ne.s32.totalorder %s598_s19, %s594_s18  ;;  %p153_p4 = scmp.eq.s32.totalorder %s420_s23, 1 }
   0x9   : > { %s682_s27 = scalar_select %p134_p1, %s602_s20, %s136_s25  }
   0xa   : > { %p684_p5 = por %p147_p2, %p146_p0  ;;  %p688_p6 = por %p153_p4, %p152_p3 }
   0xb   : > { %p421_p7 = scmp.ge.s32.totalorder %s606_s21, 1  ;;  %p160_p8 = scmp.lt.s32.totalorder %s606_s21, 3 }
   0xc   : > { %s819_s28 = scalar_select %p684_p5, 1, 0 }
   0xd   : > { %s820_s29 = scalar_select %p688_p6, 1, 0 }
   0xe   : > { %p816_p9 = scmp.eq.s32.totalorder %s667_s22, 0  ;;  %p695_p10 = pnand %p421_p7, %p160_p8 }
   0xf   : > { %s608_s6 = smov [#allocation2]   ;;  %s512_s11 = scalar_lea.hbm %s814_s4, 384 }
  0x10   : > { %s821_s30 = scalar_select %p695_p10, 1, 0 }
  0x11   : > { %s181_s7 = sshll.u32 %s608_s6, 4  ;;  %p459_p11 = pneg %p695_p10  ;;  %s182_s7 = int_to_ptr.vmem [resolvable:$true] %s181_s7 }
  0x12   : > { %p513_p13 = scmp.ne.s32.totalorder %s814_s4, %s512_s11  ;;  %p519_p3 = scmp.lt.u32.totalorder %s512_s11, %s814_s4 }
  0x13   : > { %p703_p12 = pnand %p816_p9, %p459_p11 }
  0x15   : > { %p514_p0 = pneg %p703_p12 }
  0x17   : > { %p515_p1 = pnand %p514_p0, %p513_p13 }
  0x19   : > { %p516_p2 = pneg %p515_p1 }
  0x1b   : > { %p521_p4 = pnand %p519_p3, %p516_p2 }
  0x1d   : > { %524 = shalt.err (!%p521_p4)
}
  0x1e   : > { %s525_s16 = scalar_lea.vmem %s182_s7, 384  ;;  %p533_p9 = scmp.lt.s32.totalorder %s182_s7, %s182_s7 }
  0x1f   : > { %p526_p7 = scmp.ne.s32.totalorder %s182_s7, %s525_s16  ;;  %p534_p6 = scmp.lt.s32.totalorder %s525_s16, %s525_s16 }
  0x21   : > { %p528_p8 = pnand %p526_p7, %p514_p0  ;;  %p535_p5 = por %p534_p6, %p533_p9 }
  0x23   : > { %p529_p11 = pneg %p528_p8 }
  0x25   : > { %p536_p10 = pnand %p535_p5, %p529_p11 }
  0x27   : > { %539 = shalt.err (!%p536_p10)
}
  0x28   : > { %s609_s17 = smov 128   ;;  %s610_s23 = smov 8  }
  0x29   : > { %462 = dma.hbm_to_vmem [thread:$0]  (!%p703_p12), %s814_s4, 384, %s182_s7, [#allocation3], %s609_s17, %s609_s17, %s610_s23  }
  0x2a   : > { %p823_p13 = scmp.ne.s32.totalorder %s821_s30, 0 }
  0x2b   : > { %p824_p1 = scmp.eq.s32.totalorder (!%p823_p13), %s667_s22, 0 }
  0x2c   : > { %205 = sbr.rel (%p823_p13) target bundleno = 298 (0x12a), region = 40 }
  0x33   : > { %585 = dma.done.wait (%p824_p1), [#allocation3], 384   ;;  %p825_p0 = pmov %p824_p1 }
  0x34   : > { %s230_s6 = sand.u32 1, %s598_s19   ;;  %v611_v0 = vmov 0.0   ;;  %vm330_vm0 = vcmask 260096   ;;  %vm612_vm1 = vmmov 0   ;;  %p233_p5 = scmp.lt.s32.totalorder %s667_s22, 1  ;;  %v509_v1 = vld [vmem:[%s811_s1] sm:$0xff]  }
  0x35   : > { %587 = vsyncadd (%p825_p0), [#allocation3], 4294966912  ;;  %s451_s8 = smul.u32 24, %s230_s6  ;;  %441 = vmatprep.subr.bf16.mxu0 %v611_v0  ;;  %447 = vmatprep.mubr.msk.bf16.mxu0 %vm612_vm1, %v611_v0  ;;  %v510_v2 = vld [vmem:[%s811_s1 + $0x8] sm:$0xff]   ;;  %v511_v3 = vld [vmem:[%s811_s1 + $0x10] sm:$0xff]   ;;  %vm273_vm2 = vcmask 392192  }
  0x36   : > { %s234_s7 = scalar_select %p233_p5, %s667_s22, 1  ;;  %442 = vmatpush3.bf16.msra.mxu0 %v509_v1  ;;  %v318_v7 = vld [vmem:[%s813_s3] sm:$0x1]  ;;  %vm321_vm3 = vcmask 253952   ;;  %v323_v12 = vld [vmem:[#allocation2 + $0x1] sm:$0xff]  ;;  %vm327_vm4 = vcmask 261120  }
  0x37   : > { %s733_s30 = scalar_lea.vmem [#allocation5], %s451_s8  ;;  %443 = vmatprep.subr.bf16.mxu0 %v611_v0  ;;  %v319_v8 = vld [vmem:[#allocation2] sm:$0x1]  ;;  %s452_s9 = smul.u32 384, %s667_s22  ;;  %v324_v16 = vld [vmem:[#allocation2 + $0x9] sm:$0xff] }
  0x38   : > { %331 = vst.msk [vmem:[%s733_s30 + $0x11] sm:$0x7f] %vm330_vm0, %v611_v0  ;;  %s436_s11 = sshll.u32 %s234_s7, 4  ;;  %v320_v9 = vadd.f32 %v319_v8, %v318_v7  ;;  %v428_v10 = vld [vmem:[%s812_s2] ss:$0 sm:$0xff]  ;;  %s346_s10 = sshll.u32 %s733_s30, 4  ;;  %s763_s10 = int_to_ptr.vmem [resolvable:$true] %s346_s10 }
  0x39   : > { %s237_s16 = scalar_lea.vmem %s810_s0, %s436_s11  ;;  %s761_s13 = scalar_lea.hbm %s815_s5, %s452_s9 }
  0x3a   : > { %444 = vmatpush3.bf16.msra.mxu0 %v510_v2  ;;  %v239_v4 = vld [vmem:[%s237_s16] sm:$0xff]  ;;  %v240_v5 = vld [vmem:[%s237_s16 + $0x8] sm:$0xff]  ;;  %322 = vst.msk [vmem:[%s733_s30] sm:$0x1] %vm321_vm3, %v320_v9  ;;  %s769_s22 = scalar_lea.sflag [#allocation4], %s230_s6  ;;  %s540_s14 = scalar_lea.vmem %s763_s10, 384 }
  0x3b   : > { %445 = vmatprep.subr.bf16.mxu0 %v611_v0  ;;  %v241_v6 = vpack.c.bf16 %v240_v5, %v239_v4  ;;  %p541_p6 = scmp.ne.s32.totalorder %s763_s10, %s540_s14  ;;  %p826_p9 = scmp.ne.s32.totalorder %s819_s28, 0 }
  0x3c   : > { %s613_s15 = smov [#allocation5]  }
  0x3d   : > { %p542_p10 = pnand %p541_p6, %p826_p9  ;;  %s544_s16 = sshll.u32 %s613_s15, 4  ;;  %s545_s16 = int_to_ptr.vmem [resolvable:$false] %s544_s16 }
  0x3e   : > { %446 = vmatpush3.bf16.msra.mxu0 %v511_v3  ;;  %s546_s17 = scalar_lea.vmem %s545_s16, 768  ;;  %p547_p2 = scmp.lt.s32.totalorder %s763_s10, %s545_s16 }
  0x3f   : > { %p543_p12 = pneg %p542_p10  ;;  %p548_p3 = scmp.lt.s32.totalorder %s546_s17, %s540_s14 }
  0x41   : > { %448 = vmatmul.mubr.msk.bf16.vlgmr.msra.gmra.mrb[0].mxu0 %vm273_vm2, %v241_v6  ;;  %p549_p4 = por %p548_p3, %p547_p2 }
  0x43   : > { %p550_p7 = pnand %p549_p4, %p543_p12 }
 0x114   : > { %v311_v11 = vpop.f32.mrb[0].mxu0 }
 0x115   : > { %v312_v13 = vadd.f32 %v428_v10, %v311_v11  ;;  %v449_v14 = vpop.f32.mrb[1].mxu0 }
 0x116   : > { %v314_v15 = vpop.f32.mrb[2].mxu0 }
 0x117   : > { %v325_v17 = vadd.f32 %v323_v12, %v312_v13  ;;  %v315_v18 = vadd.f32 %v428_v10, %v314_v15  ;;  %v450_v19 = vpop.f32.mrb[3].mxu0 }
 0x119   : > { %328 = vst.msk [vmem:[%s733_s30 + $0x1] sm:$0xff] %vm327_vm4, %v325_v17  ;;  %v326_v20 = vadd.f32 %v324_v16, %v315_v18 }
 0x11b   : > { %329 = vst.msk [vmem:[%s733_s30 + $0x9] sm:$0xff] %vm327_vm4, %v326_v20 }
 0x11c   : > { %553 = shalt.err (!%p550_p7)
}
 0x11d   : > { %s554_s6 = scalar_lea.hbm %s761_s13, 384  ;;  %s558_s25 = scalar_lea.hbm %s815_s5, 768 }
 0x11e   : > { %p555_p8 = scmp.ne.s32.totalorder %s761_s13, %s554_s6  ;;  %p559_p1 = scmp.lt.u32.totalorder %s761_s13, %s815_s5 }
 0x11f   : > { %p560_p0 = scmp.lt.u32.totalorder %s558_s25, %s554_s6  ;;  %p562_p6 = scmp.lt.u32.totalorder %s554_s6, %s761_s13 }
 0x120   : > { %p556_p11 = pnand %p555_p8, %p826_p9 }
 0x121   : > { %p561_p5 = por %p560_p0, %p559_p1 }
 0x122   : > { %p557_p13 = pneg %p556_p11 }
 0x123   : > { %p563_p10 = por %p562_p6, %p561_p5 }
 0x125   : > { %p564_p12 = pnand %p563_p10, %p557_p13 }
 0x127   : > { %567 = shalt.err (!%p564_p12)
}
 0x128   : > { %s614_s7 = smov 128   ;;  %s615_s9 = smov 8  }
 0x129   : > { %457 = dma.vmem_to_hbm [thread:$0]  (%p826_p9), %s763_s10, 384, %s761_s13, %s769_s22, %s614_s7, %s614_s7, %s615_s9  }
 0x12a PF: > { %p469_p2 = scmp.ge.s32.totalorder %s606_s21, 2  ;;  %s361_s11 = sand.u32 1, %s594_s18  }
 0x12b   : > { %p827_p3 = scmp.ne.s32.totalorder %s820_s29, 0  ;;  %s362_s12 = scalar_lea.sflag [#allocation4], %s361_s11 }
 0x12d   : > { %p464_p4 = pnand %p469_p2, %p827_p3 }
 0x12f   : > { %589 = dma.done.wait (!%p464_p4), %s362_s12, 384  }
 0x130   : > { %591 = vsyncadd (!%p464_p4), %s362_s12, 4294966912  ;;  %p16_p7 = scmp.ge.s32.totalorder %s671_s24, 4   ;;  %s828_s18 = smov %s598_s19 }
 0x131   : > { %s829_s19 = smov %s602_s20  ;;  %s830_s20 = smov %s682_s27 }
 0x132   : > { %s831_s21 = smov %s671_s24  ;;  %18 = sbr.rel (!%p16_p7) target bundleno = 4 (0x4), region = 80 }
 0x139   :  { %367 = vsyncpa [#allocation3], 1 }
 0x13a   :  { %369 = vsyncpa [#allocation3 + $0x1], 1 }
 0x13b   :  { %370 = vsyncpa [#allocation4], 1 }
 0x13c   :  { %372 = vsyncpa [#allocation4 + $0x1], 1 }

</bundles_post_ra>
